<compile_context>
chip_gen: v5e
topology: v5e:2x2
jax: 0.10.0
libtpu: 0.0.40
codegen_flags: <defaults>
</compile_context>

<pallas_src>
import functools
import math

import jax
import jax.numpy as jnp
import numpy as np
from jax.experimental import pallas as pl
from jax.experimental.pallas import tpu as pltpu


# ----------------------------------------------------------------------------------------------
# Pass 1: CBA gate.  Accumulate sum/max over T, then gate = sigmoid(fc(mean) + fc(max)).
# ----------------------------------------------------------------------------------------------
def _gate_kernel(x_ref, w1_ref, w2_ref, gate_ref, sum_ref, max_ref, *, T, r_last):
    i = pl.program_id(0)
    n = pl.num_programs(0)
    x = x_ref[...].astype(jnp.float32)                       # (tb, B, C)

    @pl.when(i == 0)
    def _():
        sum_ref[...] = jnp.zeros(sum_ref.shape, sum_ref.dtype)
        max_ref[...] = jnp.full(max_ref.shape, -jnp.inf, max_ref.dtype)

    @pl.when(i < n - 1)                                       # full interior blocks
    def _():
        sum_ref[...] = sum_ref[...] + jnp.sum(x, axis=0)
        max_ref[...] = jnp.maximum(max_ref[...], jnp.max(x, axis=0))

    @pl.when(i == n - 1)                                      # last (possibly ragged) block
    def _():
        xs = x[:r_last]                                       # static slice: valid rows only
        s = sum_ref[...] + jnp.sum(xs, axis=0)
        mx = jnp.maximum(max_ref[...], jnp.max(xs, axis=0))

        w1 = w1_ref[...].astype(jnp.float32)                  # (C, C//ratio)
        w2 = w2_ref[...].astype(jnp.float32)                  # (C//ratio, H)

        def fc(z):
            h = jnp.dot(z, w1, preferred_element_type=jnp.float32)
            h = jnp.where(h >= 0, h, 0.2 * h)                 # LeakyReLU(0.2)
            return jnp.dot(h, w2, preferred_element_type=jnp.float32)

        gate_ref[...] = jax.nn.sigmoid(fc(s * (1.0 / T)) + fc(mx))


# ----------------------------------------------------------------------------------------------
# Pass 2: fused conv taps + correlation linear, tiled over T.
# ----------------------------------------------------------------------------------------------
def _main_kernel_halo(xm_ref, xh_ref, wf_ref, bias_ref, gate_ref, out_ref, *, K, H, p, tb):
    B, C = xm_ref.shape[1], xm_ref.shape[2]
    F = (K + 1) * H
    wf = wf_ref[...]                                          # (C, (K+1)H), input dtype

    # One wide matmul per block (native-dtype operands, f32 accumulation on the MXU).
    y_main = jnp.dot(xm_ref[...].reshape(tb * B, C), wf,
                     preferred_element_type=jnp.float32)      # (tb*B, F)
    y_halo = jnp.dot(xh_ref[...].reshape(2 * p * B, C), wf,
                     preferred_element_type=jnp.float32)      # (2p*B, F)
    y = jnp.concatenate([y_main, y_halo], axis=0).reshape(tb + 2 * p, B, F)

    bias = bias_ref[...].astype(jnp.float32)                  # (1, 2H) = [bctx | blin]
    gate = gate_ref[...].astype(jnp.float32)                  # (B, H)

    # context branch: shift-and-add the H-wide tap slabs along time, then add bias.
    ctx = y[0:tb, :, 0:H]
    for k in range(1, K):                                     # K static -> unrolled
        ctx = ctx + y[k:k + tb, :, k * H:(k + 1) * H]
    ctx = ctx + bias[None, :, :H]

    # correlation branch: linear (+bias) gated by the precomputed CBA gate.
    corr = (y[p:p + tb, :, K * H:] + bias[None, :, H:]) * gate[None, :, :]

    out_ref[:, :, :H] = ctx.astype(out_ref.dtype)
    out_ref[:, :, H:] = corr.astype(out_ref.dtype)


def _main_kernel_1x1(xm_ref, wf_ref, bias_ref, gate_ref, out_ref, *, H, tb):
    # kernel_size == 1 (no halo): a single 1x1 conv + linear, still one fused matmul.
    B, C = xm_ref.shape[1], xm_ref.shape[2]
    y = jnp.dot(xm_ref[...].reshape(tb * B, C), wf_ref[...],
                preferred_element_type=jnp.float32).reshape(tb, B, 2 * H)
    bias = bias_ref[...].astype(jnp.float32)
    gate = gate_ref[...].astype(jnp.float32)
    ctx = y[:, :, :H] + bias[None, :, :H]
    corr = (y[:, :, H:] + bias[None, :, H:]) * gate[None, :, :]
    out_ref[:, :, :H] = ctx.astype(out_ref.dtype)
    out_ref[:, :, H:] = corr.astype(out_ref.dtype)


# ----------------------------------------------------------------------------------------------
# Wrapper
# ----------------------------------------------------------------------------------------------
def context_and_correlation(x, params, *, block_t=None):
    """x: (T, B, C) in TBC layout. Returns (T, B, 2H)."""
    T, B, C = x.shape
    wctx = params['wctx']                                     # (K, C, H)
    K, _, H = wctx.shape
    if K % 2 == 0:
        # torch.conv_tbc with padding=(K-1)//2 gives asymmetric behaviour for even K.
        raise NotImplementedError("even kernel_size is not supported")
    p = (K - 1) // 2
    Cr = params['w1'].shape[1]
    itemsize = x.dtype.itemsize

    # ---- choose a time block size -------------------------------------------------------------
    if block_t is None:
        # target ~2 MiB per x block (double-buffered by the Pallas pipeline) -> fits the default
        # 32 MiB scoped VMEM limit with plenty of headroom, including on v7x (64 MiB physical).
        row_bytes = max(B * C * itemsize, 1)
        block_t = max(8, (2 * 1024 * 1024) // row_bytes)
    m = 8 if p == 0 else (8 * 2 * p) // math.gcd(8, 2 * p)    # lcm(8, 2p): halo block alignment
    tb = max(m, ((min(int(block_t), max(T, 1)) + m - 1) // m) * m)
    G = pl.cdiv(T, tb)
    r_last = T - (G - 1) * tb                                 # valid rows in the last block

    # ---- pass 1: gate (global mean/max over T) -------------------------------------------------
    gate_cost = pl.CostEstimate(
        flops=int(2 * T * B * C + 4 * B * (C * Cr + Cr * H)),
        transcendentals=int(B * H),
        bytes_accessed=int(T * B * C * itemsize + (C * Cr + Cr * H) * 4 + B * H * 4),
    )
    gate = pl.pallas_call(
        functools.partial(_gate_kernel, T=T, r_last=r_last),
        grid=(G,),
        in_specs=[
            pl.BlockSpec((tb, B, C), lambda i: (i, 0, 0)),
            pl.BlockSpec((C, Cr), lambda i: (0, 0)),
            pl.BlockSpec((Cr, H), lambda i: (0, 0)),
        ],
        out_specs=pl.BlockSpec((B, H), lambda i: (0, 0)),
        out_shape=jax.ShapeDtypeStruct((B, H), jnp.float32),
        scratch_shapes=[pltpu.VMEM((B, C), jnp.float32),      # running sum over T
                        pltpu.VMEM((B, C), jnp.float32)],     # running max over T
        compiler_params=pltpu.CompilerParams(dimension_semantics=("arbitrary",)),
        cost_estimate=gate_cost,
    )(x, params['w1'], params['w2'])

    # ---- pass 2: conv + gated linear, tiled over T ----------------------------------------------
    Tpad = G * tb + 2 * p
    x_pad = jnp.pad(x, ((p, Tpad - p - T), (0, 0), (0, 0)))   # zero halo + tail padding (HBM)
    F = (K + 1) * H
    # fused weight: [wctx[0] | ... | wctx[K-1] | wlin], fed to the MXU in the input's dtype.
    wfused = jnp.concatenate([wctx[k] for k in range(K)] + [params['wlin']],
                             axis=-1).astype(x.dtype)         # (C, (K+1)H)
    bias2 = jnp.concatenate([params['bctx'], params['blin']]
                            ).reshape(1, 2 * H).astype(jnp.float32)

    main_cost = pl.CostEstimate(
        flops=int(2 * Tpad * B * C * F + 3 * G * tb * B * H * (K + 1)),
        transcendentals=0,
        bytes_accessed=int(Tpad * B * C * itemsize + C * F * itemsize
                           + 2 * H * 4 + B * H * 4 + T * B * 2 * H * itemsize),
    )

    if p > 0:
        hs = tb // (2 * p)                                    # halo blocks per time tile
        in_specs = [
            pl.BlockSpec((tb, B, C), lambda i: (i, 0, 0)),              # main rows of x_pad
            pl.BlockSpec((2 * p, B, C), lambda i: (i * hs + hs, 0, 0)), # trailing 2p-row halo
            pl.BlockSpec((C, F), lambda i: (0, 0)),
            pl.BlockSpec((1, 2 * H), lambda i: (0, 0)),
            pl.BlockSpec((B, H), lambda i: (0, 0)),
        ]
        kern = functools.partial(_main_kernel_halo, K=K, H=H, p=p, tb=tb)
        args = (x_pad, x_pad, wfused, bias2, gate)
    else:
        in_specs = [
            pl.BlockSpec((tb, B, C), lambda i: (i, 0, 0)),
            pl.BlockSpec((C, F), lambda i: (0, 0)),
            pl.BlockSpec((1, 2 * H), lambda i: (0, 0)),
            pl.BlockSpec((B, H), lambda i: (0, 0)),
        ]
        kern = functools.partial(_main_kernel_1x1, H=H, tb=tb)
        args = (x_pad, wfused, bias2, gate)

    out = pl.pallas_call(
        kern,
        grid=(G,),
        in_specs=in_specs,
        out_specs=pl.BlockSpec((tb, B, 2 * H), lambda i: (i, 0, 0)),
        out_shape=jax.ShapeDtypeStruct((T, B, 2 * H), x.dtype),
        compiler_params=pltpu.CompilerParams(dimension_semantics=("parallel",)),
        cost_estimate=main_cost,
    )(*args)
    return out


# ----------------------------------------------------------------------------------------------
# Pure-JAX reference (matches the PyTorch forward pass in eval mode) + synthetic params
# ----------------------------------------------------------------------------------------------
def reference(x, params):
    x = x.astype(jnp.float32)
    T, B, C = x.shape
    wctx, bctx = params['wctx'], params['bctx']
    K, _, H = wctx.shape
    p = (K - 1) // 2
    x_pad = jnp.pad(x, ((p, p), (0, 0), (0, 0)))
    ctx = jnp.broadcast_to(bctx[None, None, :], (T, B, H))
    for k in range(K):
        ctx = ctx + jnp.einsum('tbc,ch->tbh', x_pad[k:k + T], wctx[k])

    def fc(z):
        h1 = z @ params['w1']
        h1 = jnp.where(h1 >= 0, h1, 0.2 * h1)
        return h1 @ params['w2']

    gate = jax.nn.sigmoid(fc(jnp.mean(x, axis=0)) + fc(jnp.max(x, axis=0)))
    lin = jnp.einsum('tbc,ch->tbh', x, params['wlin']) + params['blin'][None, None, :]
    corr = lin * gate[None, :, :]
    return jnp.concatenate([ctx, corr], axis=2)


def init_params(key, in_channels, out_channels, kernel_size, ratio=8):
    """Deterministic synthetic parameter init (shapes from the module's __init__)."""
    hidden = out_channels // 2                                 # additive=False
    k = jax.random.split(key, 6)
    s_ctx = 1.0 / np.sqrt(kernel_size * in_channels)
    s_fc1 = 1.0 / np.sqrt(in_channels)
    s_fc2 = 1.0 / np.sqrt(in_channels // ratio)
    return {
        # context: ConvTBC(in, hidden, K) weight (K, C_in, C_out) + bias
        'wctx': jax.random.uniform(k[0], (kernel_size, in_channels, hidden),
                                   jnp.float32, -s_ctx, s_ctx),
        'bctx': jax.random.uniform(k[1], (hidden,), jnp.float32, -s_ctx, s_ctx),
        # CBA.fc: ConvTBC(C, C//ratio, 1, bias=False), ConvTBC(C//ratio, hidden, 1, bias=False)
        'w1': jax.random.uniform(k[2], (in_channels, in_channels // ratio),
                                 jnp.float32, -s_fc1, s_fc1),
        'w2': jax.random.uniform(k[3], (in_channels // ratio, hidden),
                                 jnp.float32, -s_fc2, s_fc2),
        # CBA.linear: Linear(C, hidden) — stored pre-transposed as (C, hidden)
        'wlin': jax.random.uniform(k[4], (in_channels, hidden),
                                   jnp.float32, -s_fc1, s_fc1),
        'blin': jax.random.uniform(k[5], (hidden,), jnp.float32, -s_fc1, s_fc1),
    }


if __name__ == "__main__":
    T, B = 40, 2                      # T deliberately not a multiple of the block size
    in_channels, out_channels = 32, 16
    kernel_size = 3

    key = jax.random.PRNGKey(0)
    kx, kp = jax.random.split(key)
    x = jax.random.normal(kx, (T, B, in_channels), jnp.float32)   # TBC layout
    params = init_params(kp, in_channels, out_channels, kernel_size)

    ref = jax.block_until_ready(reference(x, params))

    # tiled path (grid of 3 time blocks, ragged tail) ...
    out_tiled = jax.block_until_ready(context_and_correlation(x, params, block_t=16))
    assert out_tiled.shape == (T, B, out_channels), out_tiled.shape
    np.testing.assert_allclose(np.asarray(out_tiled), np.asarray(ref), rtol=1e-5, atol=1e-5)

    # ... and the auto block-size path (single block).
    out_auto = jax.block_until_ready(context_and_correlation(x, params))
    np.testing.assert_allclose(np.asarray(out_auto), np.asarray(ref), rtol=1e-5, atol=1e-5)

    print("KERNEL_OK")
</pallas_src>

<mosaic_0001>
module attributes {stable_mosaic.version = 11 : i64} {
  func.func @_gate_kernel(%arg0: i32, %arg1: memref<16x2x32xf32, #tpu.memory_space<vmem>>, %arg2: memref<32x4xf32, #tpu.memory_space<vmem>>, %arg3: memref<4x8xf32, #tpu.memory_space<vmem>>, %arg4: memref<2x8xf32, #tpu.memory_space<vmem>>, %arg5: memref<2x32xf32, #tpu.memory_space<vmem>>, %arg6: memref<2x32xf32, #tpu.memory_space<vmem>>) attributes {dimension_semantics = [#tpu.dimension_semantics<arbitrary>], iteration_bounds = array<i64: 3>, scalar_prefetch = 0 : i64, scratch_operands = 2 : i64, tpu.core_type = #tpu.core_type<tc>, window_params = [{transform_indices = @transform_0, window_bounds = array<i64: 16, 2, 32>}, {pipeline_mode = #tpu.pipeline_mode<synchronous>, transform_indices = @transform_1, window_bounds = array<i64: 32, 4>}, {pipeline_mode = #tpu.pipeline_mode<synchronous>, transform_indices = @transform_2, window_bounds = array<i64: 4, 8>}, {pipeline_mode = #tpu.pipeline_mode<synchronous>, transform_indices = @transform_3, window_bounds = array<i64: 2, 8>}]} {
    %c0 = arith.constant 0 : index
    %c0_0 = arith.constant 0 : index
    %c0_1 = arith.constant 0 : index
    %0 = vector.load %arg1[%c0, %c0_0, %c0_1] : memref<16x2x32xf32, #tpu.memory_space<vmem>>, vector<16x2x32xf32>
    %c0_i32 = arith.constant 0 : i32
    %1 = arith.cmpi eq, %arg0, %c0_i32 : i32
    %2 = arith.extui %1 : i1 to i32
    %c0_i32_2 = arith.constant 0 : i32
    %3 = arith.cmpi ne, %2, %c0_i32_2 : i32
    scf.if %3 {
      %cst = arith.constant 0.000000e+00 : f32
      %10 = vector.broadcast %cst : f32 to vector<2x32xf32>
      %c0_6 = arith.constant 0 : index
      %c0_7 = arith.constant 0 : index
      %11 = vector.load %arg5[%c0_6, %c0_7] : memref<2x32xf32, #tpu.memory_space<vmem>>, vector<2x32xf32>
      tpu.vector_store %arg5[%c0_6, %c0_7], %10 {strides = array<i32>} : memref<2x32xf32, #tpu.memory_space<vmem>>, vector<2x32xf32>,
      %cst_8 = arith.constant 0xFF800000 : f32
      %12 = vector.broadcast %cst_8 : f32 to vector<2x32xf32>
      %c0_9 = arith.constant 0 : index
      %c0_10 = arith.constant 0 : index
      %13 = vector.load %arg6[%c0_9, %c0_10] : memref<2x32xf32, #tpu.memory_space<vmem>>, vector<2x32xf32>
      tpu.vector_store %arg6[%c0_9, %c0_10], %12 {strides = array<i32>} : memref<2x32xf32, #tpu.memory_space<vmem>>, vector<2x32xf32>,
    } else {
    }
    %c2_i32 = arith.constant 2 : i32
    %4 = arith.cmpi slt, %arg0, %c2_i32 : i32
    %5 = arith.extui %4 : i1 to i32
    %c0_i32_3 = arith.constant 0 : i32
    %6 = arith.cmpi ne, %5, %c0_i32_3 : i32
    scf.if %6 {
      %c0_6 = arith.constant 0 : index
      %c0_7 = arith.constant 0 : index
      %10 = vector.load %arg5[%c0_6, %c0_7] : memref<2x32xf32, #tpu.memory_space<vmem>>, vector<2x32xf32>
      %cst = arith.constant dense<0.000000e+00> : vector<2x32xf32>
      %11 = vector.multi_reduction <add>, %0, %cst [0] : vector<16x2x32xf32> to vector<2x32xf32>
      %12 = arith.addf %10, %11 : vector<2x32xf32>
      %c0_8 = arith.constant 0 : index
      %c0_9 = arith.constant 0 : index
      %13 = vector.load %arg5[%c0_8, %c0_9] : memref<2x32xf32, #tpu.memory_space<vmem>>, vector<2x32xf32>
      tpu.vector_store %arg5[%c0_8, %c0_9], %12 {strides = array<i32>} : memref<2x32xf32, #tpu.memory_space<vmem>>, vector<2x32xf32>,
      %c0_10 = arith.constant 0 : index
      %c0_11 = arith.constant 0 : index
      %14 = vector.load %arg6[%c0_10, %c0_11] : memref<2x32xf32, #tpu.memory_space<vmem>>, vector<2x32xf32>
      %cst_12 = arith.constant dense<0xFF800000> : vector<2x32xf32>
      %15 = vector.multi_reduction <maximumf>, %0, %cst_12 [0] : vector<16x2x32xf32> to vector<2x32xf32>
      %16 = arith.maximumf %14, %15 : vector<2x32xf32>
      %c0_13 = arith.constant 0 : index
      %c0_14 = arith.constant 0 : index
      %17 = vector.load %arg6[%c0_13, %c0_14] : memref<2x32xf32, #tpu.memory_space<vmem>>, vector<2x32xf32>
      tpu.vector_store %arg6[%c0_13, %c0_14], %16 {strides = array<i32>} : memref<2x32xf32, #tpu.memory_space<vmem>>, vector<2x32xf32>,
    } else {
    }
    %c2_i32_4 = arith.constant 2 : i32
    %7 = arith.cmpi eq, %arg0, %c2_i32_4 : i32
    %8 = arith.extui %7 : i1 to i32
    %c0_i32_5 = arith.constant 0 : i32
    %9 = arith.cmpi ne, %8, %c0_i32_5 : i32
    scf.if %9 {
      %10 = vector.extract_strided_slice %0 {offsets = [0, 0, 0], sizes = [8, 2, 32], strides = [1, 1, 1]} : vector<16x2x32xf32> to vector<8x2x32xf32>
      %c0_6 = arith.constant 0 : index
      %c0_7 = arith.constant 0 : index
      %11 = vector.load %arg5[%c0_6, %c0_7] : memref<2x32xf32, #tpu.memory_space<vmem>>, vector<2x32xf32>
      %cst = arith.constant dense<0.000000e+00> : vector<2x32xf32>
      %12 = vector.multi_reduction <add>, %10, %cst [0] : vector<8x2x32xf32> to vector<2x32xf32>
      %13 = arith.addf %11, %12 : vector<2x32xf32>
      %c0_8 = arith.constant 0 : index
      %c0_9 = arith.constant 0 : index
      %14 = vector.load %arg6[%c0_8, %c0_9] : memref<2x32xf32, #tpu.memory_space<vmem>>, vector<2x32xf32>
      %cst_10 = arith.constant dense<0xFF800000> : vector<2x32xf32>
      %15 = vector.multi_reduction <maximumf>, %10, %cst_10 [0] : vector<8x2x32xf32> to vector<2x32xf32>
      %16 = arith.maximumf %14, %15 : vector<2x32xf32>
      %c0_11 = arith.constant 0 : index
      %c0_12 = arith.constant 0 : index
      %17 = vector.load %arg2[%c0_11, %c0_12] : memref<32x4xf32, #tpu.memory_space<vmem>>, vector<32x4xf32>
      %c0_13 = arith.constant 0 : index
      %c0_14 = arith.constant 0 : index
      %18 = vector.load %arg3[%c0_13, %c0_14] : memref<4x8xf32, #tpu.memory_space<vmem>>, vector<4x8xf32>
      %cst_15 = arith.constant 2.500000e-02 : f32
      %19 = vector.broadcast %cst_15 : f32 to vector<2x32xf32>
      %20 = arith.mulf %13, %19 : vector<2x32xf32>
      %cst_16 = arith.constant dense<0.000000e+00> : vector<2x4xf32>
      %21 = tpu.matmul %20, %17, %cst_16 {dimension_numbers = #tpu.dot_dimension_numbers<[1], [0], [0], [1], [0, 0, 1, 1], [], []>} : vector<2x32xf32>, vector<32x4xf32>, vector<2x4xf32> -> vector<2x4xf32>
      %cst_17 = arith.constant 0.000000e+00 : f32
      %22 = vector.broadcast %cst_17 : f32 to vector<2x4xf32>
      %23 = arith.cmpf oge, %21, %22 : vector<2x4xf32>
      %cst_18 = arith.constant 2.000000e-01 : f32
      %24 = vector.broadcast %cst_18 : f32 to vector<2x4xf32>
      %25 = arith.mulf %24, %21 : vector<2x4xf32>
      %26 = arith.select %23, %21, %25 : vector<2x4xi1>, vector<2x4xf32>
      %cst_19 = arith.constant dense<0.000000e+00> : vector<2x8xf32>
      %27 = tpu.matmul %26, %18, %cst_19 {dimension_numbers = #tpu.dot_dimension_numbers<[1], [0], [0], [1], [0, 0, 1, 1], [], []>} : vector<2x4xf32>, vector<4x8xf32>, vector<2x8xf32> -> vector<2x8xf32>
      %cst_20 = arith.constant dense<0.000000e+00> : vector<2x4xf32>
      %28 = tpu.matmul %16, %17, %cst_20 {dimension_numbers = #tpu.dot_dimension_numbers<[1], [0], [0], [1], [0, 0, 1, 1], [], []>} : vector<2x32xf32>, vector<32x4xf32>, vector<2x4xf32> -> vector<2x4xf32>
      %cst_21 = arith.constant 0.000000e+00 : f32
      %29 = vector.broadcast %cst_21 : f32 to vector<2x4xf32>
      %30 = arith.cmpf oge, %28, %29 : vector<2x4xf32>
      %cst_22 = arith.constant 2.000000e-01 : f32
      %31 = vector.broadcast %cst_22 : f32 to vector<2x4xf32>
      %32 = arith.mulf %31, %28 : vector<2x4xf32>
      %33 = arith.select %30, %28, %32 : vector<2x4xi1>, vector<2x4xf32>
      %cst_23 = arith.constant dense<0.000000e+00> : vector<2x8xf32>
      %34 = tpu.matmul %33, %18, %cst_23 {dimension_numbers = #tpu.dot_dimension_numbers<[1], [0], [0], [1], [0, 0, 1, 1], [], []>} : vector<2x4xf32>, vector<4x8xf32>, vector<2x8xf32> -> vector<2x8xf32>
      %35 = arith.addf %27, %34 : vector<2x8xf32>
      %36 = arith.negf %35 : vector<2x8xf32>
      %37 = math.exp %36 : vector<2x8xf32>
      %cst_24 = arith.constant 1.000000e+00 : f32
      %38 = vector.broadcast %cst_24 : f32 to vector<2x8xf32>
      %39 = arith.addf %38, %37 : vector<2x8xf32>
      %40 = arith.divf %38, %39 : vector<2x8xf32>
      %c0_25 = arith.constant 0 : index
      %c0_26 = arith.constant 0 : index
      %41 = vector.load %arg4[%c0_25, %c0_26] : memref<2x8xf32, #tpu.memory_space<vmem>>, vector<2x8xf32>
      tpu.vector_store %arg4[%c0_25, %c0_26], %40 {strides = array<i32>} : memref<2x8xf32, #tpu.memory_space<vmem>>, vector<2x8xf32>,
    } else {
    }
    return
  }
  func.func @transform_0(%arg0: i32) -> (i32, i32, i32) {
    %c0_i32 = arith.constant 0 : i32
    %c0_i32_0 = arith.constant 0 : i32
    %c0_i32_1 = arith.constant 0 : i32
    return %arg0, %c0_i32, %c0_i32_0 : i32, i32, i32
  }
  func.func @transform_1(%arg0: i32) -> (i32, i32) {
    %c0_i32 = arith.constant 0 : i32
    %c0_i32_0 = arith.constant 0 : i32
    %c0_i32_1 = arith.constant 0 : i32
    return %c0_i32, %c0_i32_0 : i32, i32
  }
  func.func @transform_2(%arg0: i32) -> (i32, i32) {
    %c0_i32 = arith.constant 0 : i32
    %c0_i32_0 = arith.constant 0 : i32
    %c0_i32_1 = arith.constant 0 : i32
    return %c0_i32, %c0_i32_0 : i32, i32
  }
  func.func @transform_3(%arg0: i32) -> (i32, i32) {
    %c0_i32 = arith.constant 0 : i32
    %c0_i32_0 = arith.constant 0 : i32
    %c0_i32_1 = arith.constant 0 : i32
    return %c0_i32, %c0_i32_0 : i32, i32
  }
}

</mosaic_0001>

<bundles_post_ra>
// kernel: tpu_custom_call.1
= control target key start
LH: loop header
LB: loop body
LE: loop exit
PB: predicated region body
PF: predicated region fallthrough
CT: control target
= control target key end

     0   :  { %8 = vsyncpa [#allocation5], 0  ;;  %s597_s12 = smov 0   ;;  %s762_s0 = inlined_call_operand.vmem [shape: f32[40,2,32], index: 0, kind: input, shape index: {}]   ;;  %s763_s1 = inlined_call_operand.vmem [shape: f32[32,4], index: 1, kind: input, shape index: {}]   ;;  %s764_s2 = inlined_call_operand.vmem [shape: f32[4,8], index: 2, kind: input, shape index: {}]   ;;  %s765_s3 = inlined_call_operand.hbm [shape: f32[2,8], index: 3, kind: output, shape index: {}]  }
   0x1 LB: > { %s603_s13 = sadd.s32 4294967295, %s572_s12   ;;  %p496_p0 = scmp.ge.s32.totalorder %s572_s12, 1  ;;  %s572_s12 = sphi %s597_s12, %s14_s12  }
   0x2   : > { %p142_p1 = scmp.lt.s32.totalorder %s572_s12, 4 }
   0x4   : > { %p143_p2 = pnand %p496_p0, %p142_p1 }
   0x5   : > { %s497_s14 = sshll.u32 (!%p143_p2), %s603_s13, 4  ;;  %p499_p4 = scmp.ne.s32.totalorder (!%p143_p2), %s603_s13, 0 }
   0x6   : > { %146 = sbr.rel (%p143_p2) target bundleno = 396 (0x18c), region = 32  ;;  %p170_p3 = scmp.lt.s32.totalorder (!%p143_p2), %s497_s14, 39 }
   0xb   : > { %s767_s14 = smov (!%p170_p3, %s497_s14), 39 }
   0xc   : > { %s498_s15 = sshll.u32 %s767_s14, 1 }
   0xd   : > { %s173_s18 = scalar_lea.vmem %s762_s0, %s498_s15 }
   0xe   : > { %v611_v0 = vld [vmem:[%s173_s18] sm:$0x3]  ;;  %v613_v1 = vld [vmem:[%s173_s18 + $0x2] sm:$0x3]  ;;  %v615_v2 = vld [vmem:[%s173_s18 + $0x4] sm:$0x3] }
   0xf   : > { %v617_v3 = vld [vmem:[%s173_s18 + $0x6] sm:$0x3]  ;;  %v619_v4 = vld [vmem:[%s173_s18 + $0x8] sm:$0x3]  ;;  %v621_v5 = vld [vmem:[%s173_s18 + $0xa] sm:$0x3] }
  0x10   : > { %v623_v6 = vld [vmem:[%s173_s18 + $0xc] sm:$0x3]  ;;  %v625_v7 = vld [vmem:[%s173_s18 + $0xe] sm:$0x3]  ;;  %v187_v8 = vld [vmem:[%s173_s18 + $0x10] sm:$0x3] }
  0x11   : > { %v627_v9 = vld [vmem:[%s173_s18 + $0x12] sm:$0x3]  ;;  %v629_v10 = vld [vmem:[%s173_s18 + $0x14] sm:$0x3]  ;;  %v631_v11 = vld [vmem:[%s173_s18 + $0x16] sm:$0x3] }
  0x12   : > { %v633_v12 = vld [vmem:[%s173_s18 + $0x18] sm:$0x3]  ;;  %v635_v13 = vld [vmem:[%s173_s18 + $0x1a] sm:$0x3]  ;;  %v637_v14 = vld [vmem:[%s173_s18 + $0x1c] sm:$0x3] }
  0x13   : > { %v639_v15 = vld [vmem:[%s173_s18 + $0x1e] sm:$0x3]  ;;  %198 = sbr.rel (%p499_p4) target bundleno = 27 (0x1b), region = 36 }
  0x18   : > { %vm199_vm0 = vcmask 254976   ;;  %v574_v16 = vmov 0.0   ;;  %v575_v17 = vmov -inf  }
  0x19   : > { %200 = vst.msk [vmem:[#allocation2] sm:$0x3] %vm199_vm0, %v574_v16 }
  0x1a   : > { %201 = vst.msk [vmem:[#allocation3] sm:$0x3] %vm199_vm0, %v575_v17 }
  0x1b PF: > { %p500_p5 = scmp.ge.s32.totalorder %s603_s13, 2 }
  0x1d   : > { %205 = sbr.rel (%p500_p5) target bundleno = 69 (0x45), region = 40 }
  0x22   : > { %vm207_vm1 = vcmask 254976  }
  0x23   : > { %v208_v18 = vsel %vm207_vm1, %v611_v0, 0.0  ;;  %v209_v19 = vsel %vm207_vm1, %v613_v1, 0.0  ;;  %v211_v20 = vsel %vm207_vm1, %v615_v2, 0.0  ;;  %v213_v22 = vsel %vm207_vm1, %v617_v3, 0.0 }
  0x24   : > { %v210_v21 = vadd.f32 %v209_v19, %v208_v18  ;;  %v215_v24 = vsel %vm207_vm1, %v619_v4, 0.0  ;;  %v217_v25 = vsel %vm207_vm1, %v621_v5, 0.0  ;;  %v219_v26 = vsel %vm207_vm1, %v623_v6, 0.0  ;;  %v241_v19 = vld [vmem:[#allocation3] sm:$0x3] }
  0x25   : > { %v221_v27 = vsel %vm207_vm1, %v625_v7, 0.0  ;;  %v242_v28 = vsel %vm207_vm1, %v611_v0, -inf  ;;  %v243_v29 = vsel %vm207_vm1, %v613_v1, -inf  ;;  %v244_v31 = vsel %vm207_vm1, %v615_v2, -inf }
  0x26   : > { %v212_v23 = vadd.f32 %v211_v20, %v210_v21  ;;  %v245_v32 = vsel %vm207_vm1, %v617_v3, -inf  ;;  %v246_v33 = vsel %vm207_vm1, %v619_v4, -inf  ;;  %v248_v35 = vsel %vm207_vm1, %v621_v5, -inf }
  0x27   : > { %v247_v34 = vmax.f32 %v242_v28, %v246_v33  ;;  %v250_v36 = vsel %vm207_vm1, %v623_v6, -inf  ;;  %v252_v37 = vsel %vm207_vm1, %v625_v7, -inf  ;;  %v249_v39 = vmax.f32 %v243_v29, %v248_v35  ;;  %v206_v29 = vld [vmem:[#allocation2] sm:$0x3] }
  0x28   : > { %v214_v30 = vadd.f32 %v213_v22, %v212_v23  ;;  %v251_v40 = vmax.f32 %v244_v31, %v250_v36  ;;  %v253_v41 = vmax.f32 %v245_v32, %v252_v37  ;;  %v254_v42 = vsel %vm207_vm1, %v187_v8, -inf }
  0x29   : > { %v256_v43 = vsel %vm207_vm1, %v627_v9, -inf  ;;  %v258_v44 = vsel %vm207_vm1, %v629_v10, -inf  ;;  %v260_v45 = vsel %vm207_vm1, %v631_v11, -inf  ;;  %v255_v47 = vmax.f32 %v247_v34, %v254_v42 }
  0x2a   : > { %v216_v38 = vadd.f32 %v215_v24, %v214_v30  ;;  %v257_v48 = vmax.f32 %v249_v39, %v256_v43  ;;  %v259_v49 = vmax.f32 %v251_v40, %v258_v44  ;;  %v261_v50 = vmax.f32 %v253_v41, %v260_v45 }
  0x2b   : > { %v262_v51 = vsel %vm207_vm1, %v633_v12, -inf  ;;  %v264_v52 = vsel %vm207_vm1, %v635_v13, -inf  ;;  %v266_v53 = vsel %vm207_vm1, %v637_v14, -inf  ;;  %v223_v58 = vsel %vm207_vm1, %v187_v8, 0.0 }
  0x2c   : > { %v218_v46 = vadd.f32 %v217_v25, %v216_v38  ;;  %v263_v55 = vmax.f32 %v255_v47, %v262_v51  ;;  %v265_v56 = vmax.f32 %v257_v48, %v264_v52  ;;  %v267_v57 = vmax.f32 %v259_v49, %v266_v53 }
  0x2d   : > { %v268_v59 = vsel %vm207_vm1, %v639_v15, -inf  ;;  %v225_v63 = vsel %vm207_vm1, %v627_v9, 0.0  ;;  %v227_v18 = vsel %vm207_vm1, %v629_v10, 0.0  ;;  %v229_v8 = vsel %vm207_vm1, %v631_v11, 0.0 }
  0x2e   : > { %v220_v54 = vadd.f32 %v219_v26, %v218_v46  ;;  %v269_v61 = vmax.f32 %v261_v50, %v268_v59  ;;  %v270_v62 = vmax.f32 %v263_v55, %v265_v56  ;;  %v231_v24 = vsel %vm207_vm1, %v633_v12, 0.0 }
  0x2f   : > { %v233_v9 = vsel %vm207_vm1, %v635_v13, 0.0  ;;  %v235_v10 = vsel %vm207_vm1, %v637_v14, 0.0  ;;  %v237_v28 = vsel %vm207_vm1, %v639_v15, 0.0 }
  0x30   : > { %v222_v60 = vadd.f32 %v221_v27, %v220_v54  ;;  %v271_v17 = vmax.f32 %v267_v57, %v269_v61 }
  0x32   : > { %v224_v16 = vadd.f32 %v223_v58, %v222_v60  ;;  %v272_v21 = vmax.f32 %v270_v62, %v271_v17 }
  0x34   : > { %v226_v20 = vadd.f32 %v225_v63, %v224_v16  ;;  %v273_v23 = vmax.f32 %v241_v19, %v272_v21 }
  0x36   : > { %v228_v22 = vadd.f32 %v227_v18, %v226_v20  ;;  %274 = vst.msk [vmem:[#allocation3] sm:$0x3] %vm207_vm1, %v273_v23 }
  0x38   : > { %v230_v25 = vadd.f32 %v229_v8, %v228_v22 }
  0x3a   : > { %v232_v26 = vadd.f32 %v231_v24, %v230_v25 }
  0x3c   : > { %v234_v27 = vadd.f32 %v233_v9, %v232_v26 }
  0x3e   : > { %v236_v11 = vadd.f32 %v235_v10, %v234_v27 }
  0x40   : > { %v238_v30 = vadd.f32 %v237_v28, %v236_v11 }
  0x42   : > { %v239_v31 = vadd.f32 %v238_v30, %v206_v29 }
  0x44   : > { %240 = vst.msk [vmem:[#allocation2] sm:$0x3] %vm207_vm1, %v239_v31 }
  0x45 PF: > { %p501_p6 = scmp.ne.s32.totalorder %s603_s13, 2 }
  0x47   : > { %278 = sbr.rel (%p501_p6) target bundleno = 391 (0x187), region = 44 }
  0x4c   : > { %v317_v12 = vld [vmem:[%s763_s1 + $0x18] sm:$0xff]  ;;  %v316_v13 = vld [vmem:[%s763_s1 + $0x10] sm:$0xff]  ;;  %vm280_vm2 = vcmask 254976   ;;  %v315_v33 = vld [vmem:[%s763_s1 + $0x8] sm:$0xff]  ;;  %vm320_vm3 = vcmask 261120   ;;  %vm377_vm4 = vcmask 1043456  }
  0x4d   : > { %362 = vmatpush.msra.mxu1 %v317_v12  ;;  %336 = vmatpush.msra.mxu0 %v317_v12  ;;  %v298_v14 = vsel %vm280_vm2, %v611_v0, -inf  ;;  %v299_v15 = vsel %vm280_vm2, %v613_v1, -inf  ;;  %v300_v32 = vsel %vm280_vm2, %v615_v2, -inf  ;;  %v301_v34 = vsel %vm280_vm2, %v617_v3, -inf  ;;  %v314_v42 = vld [vmem:[%s763_s1] sm:$0xff] }
  0x4e   : > { %v302_v35 = vsel %vm280_vm2, %v619_v4, -inf  ;;  %v304_v36 = vsel %vm280_vm2, %v621_v5, -inf  ;;  %v306_v37 = vsel %vm280_vm2, %v623_v6, -inf  ;;  %v308_v41 = vsel %vm280_vm2, %v625_v7, -inf  ;;  %v297_v51 = vld [vmem:[#allocation3] sm:$0x3] }
  0x4f   : > { %363 = vmatpush.msra.mxu1 %v316_v13  ;;  %337 = vmatpush.msra.mxu0 %v316_v13  ;;  %v303_v38 = vmax.f32 %v298_v14, %v302_v35  ;;  %v305_v39 = vmax.f32 %v299_v15, %v304_v36  ;;  %v307_v40 = vmax.f32 %v300_v32, %v306_v37  ;;  %v281_v44 = vsel %vm280_vm2, %v611_v0, 0.0  ;;  %v279_v59 = vld [vmem:[#allocation2] sm:$0x3] }
  0x50   : > { %v309_v43 = vmax.f32 %v301_v34, %v308_v41  ;;  %v282_v45 = vsel %vm280_vm2, %v613_v1, 0.0  ;;  %v284_v46 = vsel %vm280_vm2, %v615_v2, 0.0  ;;  %v286_v50 = vsel %vm280_vm2, %v617_v3, 0.0  ;;  %v318_v62 = vld [vmem:[%s764_s2] sm:$0xf] }
  0x51   : > { %364 = vmatpush.msra.mxu1 %v315_v33  ;;  %338 = vmatpush.msra.mxu0 %v315_v33  ;;  %v310_v47 = vmax.f32 %v303_v38, %v305_v39  ;;  %v283_v48 = vadd.f32 %v282_v45, %v281_v44  ;;  %v288_v0 = vsel %vm280_vm2, %v619_v4, 0.0  ;;  %v290_v2 = vsel %vm280_vm2, %v621_v5, 0.0 }
  0x52   : > { %v311_v49 = vmax.f32 %v307_v40, %v309_v43  ;;  %v292_v56 = vsel %vm280_vm2, %v623_v6, 0.0  ;;  %v294_v57 = vsel %vm280_vm2, %v625_v7, 0.0  ;;  %504 = vmatpush.msk.msra.mxu2 %vm377_vm4, %v318_v62  ;;  %506 = vmatpush.msk.msra.mxu3 %vm377_vm4, %v318_v62  ;;  %vm373_vm6 = vcmask 31744  }
  0x53   : > { %365 = vmatpush.msra.mxu1 %v314_v42  ;;  %339 = vmatpush.msra.mxu0 %v314_v42  ;;  %v285_v52 = vadd.f32 %v284_v46, %v283_v48  ;;  %vm443_vm11 = vcmask 58368  }
  0x54   : > { %v312_v53 = vmax.f32 %v310_v47, %v311_v49 }
  0x55   : > { %v287_v1 = vadd.f32 %v286_v50, %v285_v52 }
  0x56   : > { %v313_v54 = vmax.f32 %v297_v51, %v312_v53 }
  0x57   : > { %v289_v55 = vadd.f32 %v288_v0, %v287_v1 }
  0x58   : > { %503 = vmatmul.msk.f32.vlgmr.msra.gmra.mxu1 %vm320_vm3, %v313_v54 }
  0x59   : > { %v291_v3 = vadd.f32 %v290_v2, %v289_v55 }
  0x5b   : > { %v293_v58 = vadd.f32 %v292_v56, %v291_v3 }
  0x5d   : > { %v295_v60 = vadd.f32 %v294_v57, %v293_v58 }
  0x5f   : > { %v296_v61 = vadd.f32 %v295_v60, %v279_v59 }
  0x61   : > { %v319_v4 = vmul.f32 0.025, %v296_v61 }
  0x63   : > { %502 = vmatmul.msk.f32.vlgmr.msra.gmra.mxu0 %vm320_vm3, %v319_v4 }
  0xd5   : > { %v367_v5 = vpop.f32.mrf.mxu1 }
  0xd6   : > { %vm370_vm5 = vcmp.ge.f32.partialorder %v367_v5, 0.0  ;;  %v371_v6 = vmul.f32 0.2, %v367_v5 }
  0xd8   : > { %v372_v63 = vsel %vm370_vm5, %v367_v5, %v371_v6 }
  0xd9   : > { %505 = vmatmul.msk.f32.vlgmr.msra.gmra.mxu2 %vm373_vm6, %v372_v63 }
  0xe0   : > { %v341_v7 = vpop.f32.mrf.mxu0 }
  0xe1   : > { %vm344_vm7 = vcmp.ge.f32.partialorder %v341_v7, 0.0  ;;  %v345_v16 = vmul.f32 0.2, %v341_v7 }
  0xe3   : > { %v346_v17 = vsel %vm344_vm7, %v341_v7, %v345_v16 }
  0xe4   : > { %507 = vmatmul.msk.f32.vlgmr.msra.gmra.mxu3 %vm373_vm6, %v346_v17 }
 0x15c   : > { %v398_v18 = vpop.f32.mrf.mxu2 }
 0x167   : > { %v421_v19 = vpop.f32.mrf.mxu3 }
 0x168   : > { %v422_v20 = vadd.f32 %v421_v19, %v398_v18 }
 0x16a   : > { %v508_v21 = vmul.f32 -1.442695, %v422_v20 }
 0x16c   : > { %530 = vpow2.f32 %v508_v21 }
 0x172   : > { %v531_v8 = vpop.eup %530 }
 0x173   : > { %v427_v22 = vadd.f32 1.0, %v531_v8 }
 0x175   : > { %532 = vrcp.f32 %v427_v22  ;;  %v439_v9 = vand.u32 2147483648, %v427_v22  ;;  %v437_v10 = vand.u32 2147483647, %v427_v22  ;;  %vm433_vm9 = vweird.f32 %v427_v22 }
 0x177   : > { %v440_v28 = vor.u32 1.1754944e-38, %v439_v9  ;;  %vm438_vm12 = vcmp.eq.f32.partialorder %v437_v10, 8.507059e+37 }
 0x17b   : > { %v533_v23 = vpop.eup %532 }
 0x17c   : > { %v429_v24 = vmul.f32 %v533_v23, %v427_v22  ;;  %vm434_vm8 = vweird.f32 %v533_v23 }
 0x17d   : > { %vm435_vm10 = vmor %vm433_vm9, %vm434_vm8 }
 0x17e   : > { %v430_v25 = vsub.f32 1.0, %v429_v24 }
 0x180   : > { %v431_v26 = vmul.f32 %v533_v23, %v430_v25 }
 0x182   : > { %v432_v27 = vadd.f32 %v533_v23, %v431_v26 }
 0x184   : > { %v436_v11 = vsel %vm435_vm10, %v533_v23, %v432_v27 }
 0x185   : > { %v441_v29 = vsel %vm438_vm12, %v440_v28, %v436_v11 }
 0x186   : > { %444 = vst.msk [vmem:[#allocation4] sm:$0x3] %vm443_vm11, %v441_v29 }
 0x187 PF: > { %p517_p7 = scmp.eq.s32.totalorder %s603_s13, 2  ;;  %s576_s29 = smov [#allocation4]  }
 0x188   : > { %s451_s30 = sshll.u32 %s576_s29, 4  ;;  %s453_s6 = sshll.u32 %s765_s3, 4  ;;  %s452_s30 = int_to_ptr.vmem [resolvable:$true] %s451_s30  ;;  %s454_s6 = int_to_ptr.hbm [resolvable:$true] %s453_s6 }
 0x189   : > { %514 = dma.vmem_to_hbm [thread:$0]  (%p517_p7), %s452_s30, 32, %s454_s6, [#allocation5]  }
 0x18a   : > { %567 = dma.done.wait (%p517_p7), [#allocation5], 32  }
 0x18b   : > { %569 = vsyncadd (%p517_p7), [#allocation5], 4294967264 }
 0x18c PF: > { %s14_s12 = sadd.s32 1, %s572_s12  }
 0x18d   : > { %p11_p8 = scmp.ge.s32.totalorder %s14_s12, 5  }
 0x18f   :  { %13 = sbr.rel (!%p11_p8) target bundleno = 1 (0x1), region = 71 }
 0x194   :  { %467 = vsyncpa [#allocation5], 1 }
 0x195   :  { %469 = vsyncpa [#allocation5 + $0x1], 1 }

</bundles_post_ra>
